<compile_context>
chip_gen: v6e
topology: v6e:2x2x1
jax: 0.10.0
libtpu: 0.0.40
codegen_flags: <defaults>
</compile_context>

<pallas_src>
import math

import jax
import jax.numpy as jnp
from jax.experimental import pallas as pl
from jax.experimental.pallas import tpu as pltpu


# --------------------------------------------------------------------------
# Kernel
# --------------------------------------------------------------------------
def make_residual_kernel(B, H, W, ci, cm, co, need_skip):
    BH = B * H
    WCi, WCm, WCo = W * ci, W * cm, W * co
    f32 = jnp.float32

    def swish(v):
        return v * jax.nn.sigmoid(v)

    def kernel(x_ref,                 # (BH, WCi)
               vec_ref,               # (8, vec_w) packed scale/bias slab
               w1_ref,                # (WCi, WCm)   conv1 (BN2-scale folded)
               wrow_ref,              # (3*WCm, WCm) stacked banded 3x3 (BN3-scale folded)
               wcomb_ref,             # (WCm[+WCi], WCo) conv3 [+ skip] stacked
               o_ref,                 # (BH, WCo)
               cat3_ref,              # VMEM scratch (BH, 3*WCm)
               *maybe_cat2):          # VMEM scratch (BH, WCm+WCi) iff need_skip
        x2 = x_ref[...]

        s1 = vec_ref[0:1, 0:WCi]       # BN1 scale
        o1 = vec_ref[1:2, 0:WCi]       # BN1 bias
        b1 = vec_ref[2:3, 0:WCm]       # conv1 bias folded through BN2
        b2 = vec_ref[3:4, 0:WCm]       # conv2 bias folded through BN3
        bco = vec_ref[4:5, 0:WCo]      # conv3 (+ skip) combined bias

        # BN1 -> swish -> conv1 (1x1 as block-diag matmul, BN2 folded) -> swish
        u1 = swish(x2 * s1 + o1)
        t = swish(jnp.dot(u1, w1_ref[...], preferred_element_type=f32) + b1)

        # 3x3 conv: vertical taps via sublane roll + image-boundary mask,
        # then ONE deep-K matmul for all three horizontal-tap banded weights.
        row = jax.lax.broadcasted_iota(jnp.int32, (BH, WCm), 0)
        up = jnp.where((row % H) == 0, 0.0,
                       pltpu.roll(t, shift=1, axis=0))        # up[i] = t[i-1]
        dn = jnp.where((row % H) == (H - 1), 0.0,
                       pltpu.roll(t, shift=BH - 1, axis=0))   # dn[i] = t[i+1]
        cat3_ref[:, 0:WCm] = up                 # kernel row ky=0
        cat3_ref[:, WCm:2 * WCm] = t            # ky=1
        cat3_ref[:, 2 * WCm:3 * WCm] = dn       # ky=2
        u3 = swish(jnp.dot(cat3_ref[...], wrow_ref[...],
                           preferred_element_type=f32) + b2)

        # conv3 (+ skip on raw input) as a single matmul
        if need_skip:
            cat2_ref, = maybe_cat2
            cat2_ref[:, 0:WCm] = u3
            cat2_ref[:, WCm:WCm + WCi] = x2
            y = jnp.dot(cat2_ref[...], wcomb_ref[...],
                        preferred_element_type=f32) + bco
        else:
            y = jnp.dot(u3, wcomb_ref[...],
                        preferred_element_type=f32) + bco + x2
        o_ref[...] = y.astype(o_ref.dtype)

    return kernel


# --------------------------------------------------------------------------
# Wrapper: layout plumbing + pallas_call (single grid step, full VMEM blocks)
# --------------------------------------------------------------------------
def residual_forward(x_nchw, kparams, *, inp_dim, out_dim):
    B, C, H, W = x_nchw.shape
    assert C == inp_dim
    cm = out_dim // 2
    need_skip = inp_dim != out_dim
    BH, WCi, WCm, WCo = B * H, W * inp_dim, W * cm, W * out_dim

    # NCHW -> NHWC -> (B*H, W*Ci): lane-dense slab for the kernel.
    x2 = jnp.transpose(x_nchw, (0, 2, 3, 1)).reshape(BH, WCi)

    operands = (x2,) + tuple(kparams)

    scratch = [pltpu.VMEM((BH, 3 * WCm), jnp.float32)]
    if need_skip:
        scratch.append(pltpu.VMEM((BH, WCm + WCi), jnp.float32))

    out = pl.pallas_call(
        make_residual_kernel(B, H, W, inp_dim, cm, out_dim, need_skip),
        out_shape=jax.ShapeDtypeStruct((BH, WCo), x2.dtype),
        grid_spec=pltpu.PrefetchScalarGridSpec(
            num_scalar_prefetch=0,
            grid=(1,),                                  # single step: no pipeline overhead
            in_specs=[pl.BlockSpec(a.shape, lambda i: (0, 0)) for a in operands],
            out_specs=pl.BlockSpec((BH, WCo), lambda i: (0, 0)),
            scratch_shapes=scratch,
        ),
        compiler_params=pltpu.CompilerParams(
            dimension_semantics=("arbitrary",)),
    )(*operands)

    return out.reshape(B, H, W, out_dim).transpose(0, 3, 1, 2)   # back to NCHW


# --------------------------------------------------------------------------
# Parameter construction + preprocessing (weights only, done once)
# --------------------------------------------------------------------------
def _eye(n, k=0):
    return jnp.eye(n, k=k, dtype=jnp.float32)


def init_params(key, inp_dim, out_dim):
    """PyTorch-layout parameters: conv weights (Cout, Cin, kh, kw), biases (Cout,),
    BN (gamma, beta, running_mean, running_var)."""
    cm = out_dim // 2
    keys = iter(jax.random.split(key, 20))

    def conv_p(cin, cout, k):
        fan = cin * k * k
        bound = 1.0 / math.sqrt(fan)
        w = jax.random.uniform(next(keys), (cout, cin, k, k), jnp.float32, -bound, bound)
        b = jax.random.uniform(next(keys), (cout,), jnp.float32, -bound, bound)
        return w, b

    def bn_p(c):
        g = jax.random.uniform(next(keys), (c,), jnp.float32, 0.5, 1.5)
        b = jax.random.uniform(next(keys), (c,), jnp.float32, -0.5, 0.5)
        m = jax.random.uniform(next(keys), (c,), jnp.float32, -0.5, 0.5)
        v = jax.random.uniform(next(keys), (c,), jnp.float32, 0.5, 1.5)
        return g, b, m, v

    return dict(
        bn1=bn_p(inp_dim), conv1=conv_p(inp_dim, cm, 1),
        bn2=bn_p(cm),      conv2=conv_p(cm, cm, 3),
        bn3=bn_p(cm),      conv3=conv_p(cm, out_dim, 1),
        skip=conv_p(inp_dim, out_dim, 1),
    )


def preprocess_params(params, *, batch, height, width, inp_dim, out_dim):
    """Fold BN into scale/bias, fold BN2/BN3 scales and stage biases into the
    conv weights/biases, expand convs into W-in-lanes block-diag / banded form,
    and pack all per-lane vectors into one slab."""
    B, H, W = batch, height, width
    ci, co = inp_dim, out_dim
    cm = out_dim // 2
    eps = 1e-5
    need_skip = ci != co
    WCi, WCm, WCo = W * ci, W * cm, W * co

    def fold_bn(p):
        g, b, m, v = p
        s = g / jnp.sqrt(v + eps)
        o = b - m * s
        return jnp.tile(s, W), jnp.tile(o, W)                  # (W*c,)

    s1, o1 = fold_bn(params["bn1"])                            # acts on raw input
    s2, o2 = fold_bn(params["bn2"])
    s3, o3 = fold_bn(params["bn3"])

    # conv1 1x1 -> block-diag; fold BN2 scale into columns, conv1 bias into BN2 bias.
    w1c, b1c = params["conv1"]                                 # (cm, ci, 1, 1), (cm,)
    w1 = jnp.kron(_eye(W), w1c[:, :, 0, 0].T) * s2[None, :]    # (W*ci, W*cm)
    b1 = jnp.tile(b1c, W) * s2 + o2                            # (W*cm,)

    # conv2 3x3 -> three banded weights stacked vertically (one deep-K matmul);
    # fold BN3 scale into columns, conv2 bias into BN3 bias.
    w2c, b2c = params["conv2"]                                 # (cm, cm, 3, 3), (cm,)
    rows = []
    for ky in range(3):
        acc = jnp.zeros((WCm, WCm), jnp.float32)
        for kx in range(3):
            acc = acc + jnp.kron(_eye(W, 1 - kx), w2c[:, :, ky, kx].T)
        rows.append(acc * s3[None, :])
    wrow = jnp.concatenate(rows, axis=0)                       # (3*W*cm, W*cm)
    b2 = jnp.tile(b2c, W) * s3 + o3                            # (W*cm,)

    # conv3 1x1 (+ skip 1x1) merged into one stacked weight & combined bias.
    w3c, b3c = params["conv3"]                                 # (co, cm, 1, 1), (co,)
    w3 = jnp.kron(_eye(W), w3c[:, :, 0, 0].T)                  # (W*cm, W*co)
    bcomb = jnp.tile(b3c, W)
    if need_skip:
        wsc, bsc = params["skip"]
        wsk = jnp.kron(_eye(W), wsc[:, :, 0, 0].T)             # (W*ci, W*co)
        wcomb = jnp.concatenate([w3, wsk], axis=0)             # (W*cm+W*ci, W*co)
        bcomb = bcomb + jnp.tile(bsc, W)
    else:
        wcomb = w3                                             # identity skip added in-kernel

    # Pack per-lane vectors into a single (8, vec_w) slab (one padded tile, one DMA).
    vec_w = max(WCi, WCm, WCo)
    vec_w = ((vec_w + 127) // 128) * 128
    vec = jnp.zeros((8, vec_w), jnp.float32)
    vec = vec.at[0, :WCi].set(s1)
    vec = vec.at[1, :WCi].set(o1)
    vec = vec.at[2, :WCm].set(b1)
    vec = vec.at[3, :WCm].set(b2)
    vec = vec.at[4, :WCo].set(bcomb)

    return (vec, w1, wrow, wcomb)


# --------------------------------------------------------------------------
# Pure-JAX reference (eval-mode semantics of the PyTorch module)
# --------------------------------------------------------------------------
def reference_forward(x, params, *, inp_dim, out_dim):
    def swish(v):
        return v * jax.nn.sigmoid(v)

    def bn(v, p):
        g, b, m, var = p
        s = g / jnp.sqrt(var + 1e-5)
        return (v - m[None, :, None, None]) * s[None, :, None, None] + b[None, :, None, None]

    def conv(v, wb, pad):
        w, b = wb
        y = jax.lax.conv_general_dilated(
            v, w, window_strides=(1, 1), padding=pad,
            dimension_numbers=("NCHW", "OIHW", "NCHW"))
        return y + b[None, :, None, None]

    residual = conv(x, params["skip"], ((0, 0), (0, 0))) if inp_dim != out_dim else x
    t = conv(swish(bn(x, params["bn1"])), params["conv1"], ((0, 0), (0, 0)))
    t = conv(swish(bn(t, params["bn2"])), params["conv2"], ((1, 1), (1, 1)))
    t = conv(swish(bn(t, params["bn3"])), params["conv3"], ((0, 0), (0, 0)))
    return t + residual


# --------------------------------------------------------------------------
if __name__ == "__main__":
    B, CI, CO, H, W = 2, 16, 32, 8, 8     # batch, inp_dim, out_dim, height, width

    key = jax.random.PRNGKey(0)
    kx, kp = jax.random.split(key)
    x = jax.random.normal(kx, (B, CI, H, W), jnp.float32)      # NCHW like PyTorch
    params = init_params(kp, CI, CO)
    kparams = preprocess_params(params, batch=B, height=H, width=W,
                                inp_dim=CI, out_dim=CO)

    out = residual_forward(x, kparams, inp_dim=CI, out_dim=CO)
    out = jax.block_until_ready(out)

    ref = reference_forward(x, params, inp_dim=CI, out_dim=CO)
    assert out.shape == (B, CO, H, W)
    assert jnp.allclose(out, ref, atol=1e-4, rtol=1e-4), (
        float(jnp.max(jnp.abs(out - ref))))

    print("KERNEL_OK")
</pallas_src>

<mosaic_0001>
module attributes {stable_mosaic.version = 11 : i64} {
  func.func @kernel(%arg0: i32, %arg1: memref<16x128xf32, #tpu.memory_space<vmem>>, %arg2: memref<8x256xf32, #tpu.memory_space<vmem>>, %arg3: memref<128x128xf32, #tpu.memory_space<vmem>>, %arg4: memref<384x128xf32, #tpu.memory_space<vmem>>, %arg5: memref<256x256xf32, #tpu.memory_space<vmem>>, %arg6: memref<16x256xf32, #tpu.memory_space<vmem>>, %arg7: memref<16x384xf32, #tpu.memory_space<vmem>>, %arg8: memref<16x256xf32, #tpu.memory_space<vmem>>) attributes {dimension_semantics = [#tpu.dimension_semantics<arbitrary>], iteration_bounds = array<i64: 1>, scalar_prefetch = 0 : i64, scratch_operands = 2 : i64, tpu.core_type = #tpu.core_type<tc>, window_params = [{pipeline_mode = #tpu.pipeline_mode<synchronous>, transform_indices = @transform_0, window_bounds = array<i64: 16, 128>}, {pipeline_mode = #tpu.pipeline_mode<synchronous>, transform_indices = @transform_1, window_bounds = array<i64: 8, 256>}, {pipeline_mode = #tpu.pipeline_mode<synchronous>, transform_indices = @transform_2, window_bounds = array<i64: 128, 128>}, {pipeline_mode = #tpu.pipeline_mode<synchronous>, transform_indices = @transform_3, window_bounds = array<i64: 384, 128>}, {pipeline_mode = #tpu.pipeline_mode<synchronous>, transform_indices = @transform_4, window_bounds = array<i64: 256, 256>}, {pipeline_mode = #tpu.pipeline_mode<synchronous>, transform_indices = @transform_5, window_bounds = array<i64: 16, 256>}]} {
    %c0 = arith.constant 0 : index
    %c0_0 = arith.constant 0 : index
    %0 = vector.load %arg1[%c0, %c0_0] : memref<16x128xf32, #tpu.memory_space<vmem>>, vector<16x128xf32>
    %c0_1 = arith.constant 0 : index
    %c0_2 = arith.constant 0 : index
    %1 = vector.load %arg2[%c0_1, %c0_2] : memref<8x256xf32, #tpu.memory_space<vmem>>, vector<1x128xf32>
    %c1 = arith.constant 1 : index
    %c0_3 = arith.constant 0 : index
    %2 = vector.load %arg2[%c1, %c0_3] : memref<8x256xf32, #tpu.memory_space<vmem>>, vector<1x128xf32>
    %c2 = arith.constant 2 : index
    %c0_4 = arith.constant 0 : index
    %3 = vector.load %arg2[%c2, %c0_4] : memref<8x256xf32, #tpu.memory_space<vmem>>, vector<1x128xf32>
    %c3 = arith.constant 3 : index
    %c0_5 = arith.constant 0 : index
    %4 = vector.load %arg2[%c3, %c0_5] : memref<8x256xf32, #tpu.memory_space<vmem>>, vector<1x128xf32>
    %c4 = arith.constant 4 : index
    %c0_6 = arith.constant 0 : index
    %5 = vector.load %arg2[%c4, %c0_6] : memref<8x256xf32, #tpu.memory_space<vmem>>, vector<1x256xf32>
    %6 = vector.broadcast %1 : vector<1x128xf32> to vector<16x128xf32>
    %7 = arith.mulf %0, %6 : vector<16x128xf32>
    %8 = vector.broadcast %2 : vector<1x128xf32> to vector<16x128xf32>
    %9 = arith.addf %7, %8 : vector<16x128xf32>
    %10 = arith.negf %9 : vector<16x128xf32>
    %11 = math.exp %10 : vector<16x128xf32>
    %cst = arith.constant 1.000000e+00 : f32
    %12 = vector.broadcast %cst : f32 to vector<16x128xf32>
    %13 = arith.addf %12, %11 : vector<16x128xf32>
    %14 = arith.divf %12, %13 : vector<16x128xf32>
    %15 = arith.mulf %9, %14 : vector<16x128xf32>
    %c0_7 = arith.constant 0 : index
    %c0_8 = arith.constant 0 : index
    %16 = vector.load %arg3[%c0_7, %c0_8] : memref<128x128xf32, #tpu.memory_space<vmem>>, vector<128x128xf32>
    %cst_9 = arith.constant dense<0.000000e+00> : vector<16x128xf32>
    %17 = tpu.matmul %15, %16, %cst_9 {dimension_numbers = #tpu.dot_dimension_numbers<[1], [0], [0], [1], [0, 0, 1, 1], [], []>} : vector<16x128xf32>, vector<128x128xf32>, vector<16x128xf32> -> vector<16x128xf32>
    %18 = vector.broadcast %3 : vector<1x128xf32> to vector<16x128xf32>
    %19 = arith.addf %17, %18 : vector<16x128xf32>
    %20 = arith.negf %19 : vector<16x128xf32>
    %21 = math.exp %20 : vector<16x128xf32>
    %cst_10 = arith.constant 1.000000e+00 : f32
    %22 = vector.broadcast %cst_10 : f32 to vector<16x128xf32>
    %23 = arith.addf %22, %21 : vector<16x128xf32>
    %24 = arith.divf %22, %23 : vector<16x128xf32>
    %25 = arith.mulf %19, %24 : vector<16x128xf32>
    %26 = tpu.iota {dimensions = array<i32: 0>} : vector<16x128xi32>
    %c8_i32 = arith.constant 8 : i32
    %c0_i32 = arith.constant 0 : i32
    %27 = arith.cmpi eq, %c8_i32, %c0_i32 : i32
    %c1_i32 = arith.constant 1 : i32
    %28 = arith.select %27, %c1_i32, %c8_i32 : i32
    %29 = vector.broadcast %28 : i32 to vector<16x128xi32>
    %30 = arith.remsi %26, %29 : vector<16x128xi32>
    %c0_i32_11 = arith.constant 0 : i32
    %31 = vector.broadcast %c0_i32_11 : i32 to vector<16x128xi32>
    %32 = arith.cmpi ne, %30, %31 : vector<16x128xi32>
    %c0_i32_12 = arith.constant 0 : i32
    %33 = vector.broadcast %c0_i32_12 : i32 to vector<16x128xi32>
    %34 = arith.cmpi slt, %30, %33 : vector<16x128xi32>
    %c0_i32_13 = arith.constant 0 : i32
    %35 = arith.cmpi slt, %28, %c0_i32_13 : i32
    %36 = vector.broadcast %35 : i1 to vector<16x128xi1>
    %37 = vector.broadcast %36 : vector<16x128xi1> to vector<16x128xi1>
    %38 = arith.xori %34, %37 : vector<16x128xi1>
    %39 = arith.andi %38, %32 : vector<16x128xi1>
    %40 = vector.broadcast %28 : i32 to vector<16x128xi32>
    %41 = arith.addi %30, %40 : vector<16x128xi32>
    %42 = arith.select %39, %41, %30 : vector<16x128xi1>, vector<16x128xi32>
    %c0_i32_14 = arith.constant 0 : i32
    %43 = vector.broadcast %c0_i32_14 : i32 to vector<16x128xi32>
    %44 = arith.cmpi eq, %42, %43 : vector<16x128xi32>
    %c1_i32_15 = arith.constant 1 : i32
    %45 = tpu.dynamic_rotate %25 by %c1_i32_15 dim 0 : vector<16x128xf32>, i32 -> vector<16x128xf32>
    %cst_16 = arith.constant 0.000000e+00 : f32
    %46 = vector.broadcast %cst_16 : f32 to vector<16x128xf32>
    %47 = arith.select %44, %46, %45 : vector<16x128xi1>, vector<16x128xf32>
    %c8_i32_17 = arith.constant 8 : i32
    %c0_i32_18 = arith.constant 0 : i32
    %48 = arith.cmpi eq, %c8_i32_17, %c0_i32_18 : i32
    %c1_i32_19 = arith.constant 1 : i32
    %49 = arith.select %48, %c1_i32_19, %c8_i32_17 : i32
    %50 = vector.broadcast %49 : i32 to vector<16x128xi32>
    %51 = arith.remsi %26, %50 : vector<16x128xi32>
    %c0_i32_20 = arith.constant 0 : i32
    %52 = vector.broadcast %c0_i32_20 : i32 to vector<16x128xi32>
    %53 = arith.cmpi ne, %51, %52 : vector<16x128xi32>
    %c0_i32_21 = arith.constant 0 : i32
    %54 = vector.broadcast %c0_i32_21 : i32 to vector<16x128xi32>
    %55 = arith.cmpi slt, %51, %54 : vector<16x128xi32>
    %c0_i32_22 = arith.constant 0 : i32
    %56 = arith.cmpi slt, %49, %c0_i32_22 : i32
    %57 = vector.broadcast %56 : i1 to vector<16x128xi1>
    %58 = vector.broadcast %57 : vector<16x128xi1> to vector<16x128xi1>
    %59 = arith.xori %55, %58 : vector<16x128xi1>
    %60 = arith.andi %59, %53 : vector<16x128xi1>
    %61 = vector.broadcast %49 : i32 to vector<16x128xi32>
    %62 = arith.addi %51, %61 : vector<16x128xi32>
    %63 = arith.select %60, %62, %51 : vector<16x128xi1>, vector<16x128xi32>
    %c7_i32 = arith.constant 7 : i32
    %64 = vector.broadcast %c7_i32 : i32 to vector<16x128xi32>
    %65 = arith.cmpi eq, %63, %64 : vector<16x128xi32>
    %c15_i32 = arith.constant 15 : i32
    %66 = tpu.dynamic_rotate %25 by %c15_i32 dim 0 : vector<16x128xf32>, i32 -> vector<16x128xf32>
    %cst_23 = arith.constant 0.000000e+00 : f32
    %67 = vector.broadcast %cst_23 : f32 to vector<16x128xf32>
    %68 = arith.select %65, %67, %66 : vector<16x128xi1>, vector<16x128xf32>
    %c0_24 = arith.constant 0 : index
    %c0_25 = arith.constant 0 : index
    %69 = vector.load %arg7[%c0_24, %c0_25] : memref<16x384xf32, #tpu.memory_space<vmem>>, vector<16x128xf32>
    tpu.vector_store %arg7[%c0_24, %c0_25], %47 {strides = array<i32>} : memref<16x384xf32, #tpu.memory_space<vmem>>, vector<16x128xf32>,
    %c0_26 = arith.constant 0 : index
    %c128 = arith.constant 128 : index
    %70 = vector.load %arg7[%c0_26, %c128] : memref<16x384xf32, #tpu.memory_space<vmem>>, vector<16x128xf32>
    tpu.vector_store %arg7[%c0_26, %c128], %25 {strides = array<i32>} : memref<16x384xf32, #tpu.memory_space<vmem>>, vector<16x128xf32>,
    %c0_27 = arith.constant 0 : index
    %c256 = arith.constant 256 : index
    %71 = vector.load %arg7[%c0_27, %c256] : memref<16x384xf32, #tpu.memory_space<vmem>>, vector<16x128xf32>
    tpu.vector_store %arg7[%c0_27, %c256], %68 {strides = array<i32>} : memref<16x384xf32, #tpu.memory_space<vmem>>, vector<16x128xf32>,
    %c0_28 = arith.constant 0 : index
    %c0_29 = arith.constant 0 : index
    %72 = vector.load %arg7[%c0_28, %c0_29] : memref<16x384xf32, #tpu.memory_space<vmem>>, vector<16x384xf32>
    %c0_30 = arith.constant 0 : index
    %c0_31 = arith.constant 0 : index
    %73 = vector.load %arg4[%c0_30, %c0_31] : memref<384x128xf32, #tpu.memory_space<vmem>>, vector<384x128xf32>
    %cst_32 = arith.constant dense<0.000000e+00> : vector<16x128xf32>
    %74 = tpu.matmul %72, %73, %cst_32 {dimension_numbers = #tpu.dot_dimension_numbers<[1], [0], [0], [1], [0, 0, 1, 1], [], []>} : vector<16x384xf32>, vector<384x128xf32>, vector<16x128xf32> -> vector<16x128xf32>
    %75 = vector.broadcast %4 : vector<1x128xf32> to vector<16x128xf32>
    %76 = arith.addf %74, %75 : vector<16x128xf32>
    %77 = arith.negf %76 : vector<16x128xf32>
    %78 = math.exp %77 : vector<16x128xf32>
    %cst_33 = arith.constant 1.000000e+00 : f32
    %79 = vector.broadcast %cst_33 : f32 to vector<16x128xf32>
    %80 = arith.addf %79, %78 : vector<16x128xf32>
    %81 = arith.divf %79, %80 : vector<16x128xf32>
    %82 = arith.mulf %76, %81 : vector<16x128xf32>
    %c0_34 = arith.constant 0 : index
    %c0_35 = arith.constant 0 : index
    %83 = vector.load %arg8[%c0_34, %c0_35] : memref<16x256xf32, #tpu.memory_space<vmem>>, vector<16x128xf32>
    tpu.vector_store %arg8[%c0_34, %c0_35], %82 {strides = array<i32>} : memref<16x256xf32, #tpu.memory_space<vmem>>, vector<16x128xf32>,
    %c0_36 = arith.constant 0 : index
    %c128_37 = arith.constant 128 : index
    %84 = vector.load %arg8[%c0_36, %c128_37] : memref<16x256xf32, #tpu.memory_space<vmem>>, vector<16x128xf32>
    tpu.vector_store %arg8[%c0_36, %c128_37], %0 {strides = array<i32>} : memref<16x256xf32, #tpu.memory_space<vmem>>, vector<16x128xf32>,
    %c0_38 = arith.constant 0 : index
    %c0_39 = arith.constant 0 : index
    %85 = vector.load %arg8[%c0_38, %c0_39] : memref<16x256xf32, #tpu.memory_space<vmem>>, vector<16x256xf32>
    %c0_40 = arith.constant 0 : index
    %c0_41 = arith.constant 0 : index
    %86 = vector.load %arg5[%c0_40, %c0_41] : memref<256x256xf32, #tpu.memory_space<vmem>>, vector<256x256xf32>
    %cst_42 = arith.constant dense<0.000000e+00> : vector<16x256xf32>
    %87 = tpu.matmul %85, %86, %cst_42 {dimension_numbers = #tpu.dot_dimension_numbers<[1], [0], [0], [1], [0, 0, 1, 1], [], []>} : vector<16x256xf32>, vector<256x256xf32>, vector<16x256xf32> -> vector<16x256xf32>
    %88 = vector.broadcast %5 : vector<1x256xf32> to vector<16x256xf32>
    %89 = arith.addf %87, %88 : vector<16x256xf32>
    %c0_43 = arith.constant 0 : index
    %c0_44 = arith.constant 0 : index
    %90 = vector.load %arg6[%c0_43, %c0_44] : memref<16x256xf32, #tpu.memory_space<vmem>>, vector<16x256xf32>
    tpu.vector_store %arg6[%c0_43, %c0_44], %89 {strides = array<i32>} : memref<16x256xf32, #tpu.memory_space<vmem>>, vector<16x256xf32>,
    return
  }
  func.func @transform_0(%arg0: i32) -> (i32, i32) {
    %c0_i32 = arith.constant 0 : i32
    %c0_i32_0 = arith.constant 0 : i32
    %c0_i32_1 = arith.constant 0 : i32
    return %c0_i32, %c0_i32_0 : i32, i32
  }
  func.func @transform_1(%arg0: i32) -> (i32, i32) {
    %c0_i32 = arith.constant 0 : i32
    %c0_i32_0 = arith.constant 0 : i32
    %c0_i32_1 = arith.constant 0 : i32
    return %c0_i32, %c0_i32_0 : i32, i32
  }
  func.func @transform_2(%arg0: i32) -> (i32, i32) {
    %c0_i32 = arith.constant 0 : i32
    %c0_i32_0 = arith.constant 0 : i32
    %c0_i32_1 = arith.constant 0 : i32
    return %c0_i32, %c0_i32_0 : i32, i32
  }
  func.func @transform_3(%arg0: i32) -> (i32, i32) {
    %c0_i32 = arith.constant 0 : i32
    %c0_i32_0 = arith.constant 0 : i32
    %c0_i32_1 = arith.constant 0 : i32
    return %c0_i32, %c0_i32_0 : i32, i32
  }
  func.func @transform_4(%arg0: i32) -> (i32, i32) {
    %c0_i32 = arith.constant 0 : i32
    %c0_i32_0 = arith.constant 0 : i32
    %c0_i32_1 = arith.constant 0 : i32
    return %c0_i32, %c0_i32_0 : i32, i32
  }
  func.func @transform_5(%arg0: i32) -> (i32, i32) {
    %c0_i32 = arith.constant 0 : i32
    %c0_i32_0 = arith.constant 0 : i32
    %c0_i32_1 = arith.constant 0 : i32
    return %c0_i32, %c0_i32_0 : i32, i32
  }
}

</mosaic_0001>

<bundles_post_ra>
// kernel: tpu_custom_call.1
= control target key start
LH: loop header
LB: loop body
LE: loop exit
PB: predicated region body
PF: predicated region fallthrough
CT: control target
= control target key end

     0   :  { %10 = vsyncpa [#allocation5], 0  ;;  %s1091_s0 = inlined_call_operand.hbm [shape: f32[16,128], index: 0, kind: input, shape index: {}]   ;;  %s1092_s1 = inlined_call_operand.hbm [shape: f32[8,256], index: 1, kind: input, shape index: {}]   ;;  %s1093_s2 = inlined_call_operand.hbm [shape: f32[128,128], index: 2, kind: input, shape index: {}]   ;;  %s1094_s3 = inlined_call_operand.hbm [shape: f32[384,128], index: 3, kind: input, shape index: {}]   ;;  %s1095_s4 = inlined_call_operand.hbm [shape: f32[256,256], index: 4, kind: input, shape index: {}]   ;;  %s1096_s5 = inlined_call_operand.hbm [shape: f32[16,256], index: 5, kind: output, shape index: {}]  }
   0x1   :  { %11 = vsyncpa [#allocation8], 0 }
   0x2   :  { %12 = vsyncpa [#allocation11], 0 }
   0x3   :  { %13 = vsyncpa [#allocation6], 0  ;;  %s994_s18 = smov [#allocation7]  }
   0x4   :  { %s32_s19 = sshll.u32 %s994_s18, 4  ;;  %s33_s19 = int_to_ptr.vmem [resolvable:$true] %s32_s19 }
   0x5   :  { %s874_s20 = scalar_lea.vmem %s33_s19, 256  ;;  %p879_p1 = scmp.lt.s32.totalorder %s33_s19, %s33_s19 }
   0x6   :  { %p875_p0 = scmp.ne.s32.totalorder %s33_s19, %s874_s20  ;;  %p880_p2 = scmp.lt.s32.totalorder %s874_s20, %s874_s20 }
   0x8   :  { %p881_p3 = por %p880_p2, %p879_p1 }
   0xa   :  { %p882_p4 = pnand %p881_p3, %p875_p0 }
   0xc   :  { %885 = shalt.err (!%p882_p4)
}
   0xd   :  { %35 = dma.hbm_to_vmem [thread:$0]  %s1092_s1, 256, %s33_s19, [#allocation8]  }
   0xe   :  { %s995_s23 = smov [#allocation10]   ;;  %s996_s25 = smov [#allocation4]  }
   0xf   :  { %s53_s24 = sshll.u32 %s995_s23, 4  ;;  %s19_s26 = sshll.u32 %s996_s25, 4  ;;  %s54_s24 = int_to_ptr.vmem [resolvable:$true] %s53_s24  ;;  %s20_s26 = int_to_ptr.vmem [resolvable:$true] %s19_s26 }
  0x10   :  { %s894_s27 = scalar_lea.vmem %s54_s24, 6144  ;;  %p899_p6 = scmp.lt.s32.totalorder %s54_s24, %s54_s24 }
  0x11   :  { %p895_p5 = scmp.ne.s32.totalorder %s54_s24, %s894_s27  ;;  %p900_p7 = scmp.lt.s32.totalorder %s894_s27, %s894_s27 }
  0x13   :  { %p901_p8 = por %p900_p7, %p899_p6 }
  0x15   :  { %p902_p9 = pnand %p901_p8, %p895_p5 }
  0x17   :  { %905 = shalt.err (!%p902_p9)
}
  0x18   :  { %s997_s28 = smov 128   ;;  %s998_s29 = smov 8  }
  0x19   :  { %59 = dma.hbm_to_vmem [thread:$0]  %s1094_s3, 6144, %s54_s24, [#allocation11], %s997_s28, %s997_s28, %s998_s29  }
  0x1a   :  { %s914_s1 = scalar_lea.vmem %s20_s26, 256  ;;  %p919_p11 = scmp.lt.s32.totalorder %s20_s26, %s20_s26 }
  0x1b   :  { %p915_p10 = scmp.ne.s32.totalorder %s20_s26, %s914_s1  ;;  %p920_p12 = scmp.lt.s32.totalorder %s914_s1, %s914_s1 }
  0x1d   :  { %p921_p13 = por %p920_p12, %p919_p11 }
  0x1f   :  { %p922_p0 = pnand %p921_p13, %p915_p10 }
  0x21   :  { %925 = shalt.err (!%p922_p0)
}
  0x22   :  { %25 = dma.hbm_to_vmem [thread:$0]  %s1091_s0, 256, %s20_s26, [#allocation5], %s997_s28, %s997_s28, %s998_s29  }
  0x23   :  { %s999_s9 = smov [#allocation9]   ;;  %s1000_s11 = smov [#allocation12]  }
  0x24   :  { %s41_s10 = sshll.u32 %s999_s9, 4  ;;  %s65_s12 = sshll.u32 %s1000_s11, 4  ;;  %s42_s10 = int_to_ptr.vmem [resolvable:$true] %s41_s10  ;;  %s66_s12 = int_to_ptr.vmem [resolvable:$true] %s65_s12 }
  0x25   :  { %s934_s13 = scalar_lea.vmem %s42_s10, 2048  ;;  %p939_p2 = scmp.lt.s32.totalorder %s42_s10, %s42_s10 }
  0x26   :  { %p935_p1 = scmp.ne.s32.totalorder %s42_s10, %s934_s13  ;;  %p940_p3 = scmp.lt.s32.totalorder %s934_s13, %s934_s13 }
  0x28   :  { %p941_p4 = por %p940_p3, %p939_p2 }
  0x2a   :  { %p942_p5 = pnand %p941_p4, %p935_p1 }
  0x2c   :  { %945 = shalt.err (!%p942_p5)
}
  0x2d   :  { %47 = dma.hbm_to_vmem [thread:$0]  %s1093_s2, 2048, %s42_s10, [#allocation8], %s997_s28, %s997_s28, %s998_s29  }
  0x2e   :  { %s954_s15 = scalar_lea.vmem %s66_s12, 8192  ;;  %p959_p7 = scmp.lt.s32.totalorder %s66_s12, %s66_s12 }
  0x2f   :  { %p955_p6 = scmp.ne.s32.totalorder %s66_s12, %s954_s15  ;;  %p960_p8 = scmp.lt.s32.totalorder %s954_s15, %s954_s15 }
  0x31   :  { %p961_p9 = por %p960_p8, %p959_p7 }
  0x33   :  { %p962_p10 = pnand %p961_p9, %p955_p6 }
  0x35   :  { %965 = shalt.err (!%p962_p10)
}
  0x36   :  { %s1001_s0 = smov 256   ;;  %s1002_s16 = smov 16  }
  0x37   :  { %71 = dma.hbm_to_vmem [thread:$0]  %s1095_s4, 8192, %s66_s12, [#allocation11], %s1001_s0, %s1001_s0, %s1002_s16  }
  0x38   :  { %986 = dma.done.wait [#allocation5], 256  }
  0x39   :  { %987 = vsyncadd [#allocation5], 4294967040 }
  0x3a   :  { %988 = dma.done.wait [#allocation8], 2304  }
  0x3b   :  { %989 = vsyncadd [#allocation8], 4294964992 }
  0x3c   :  { %990 = dma.done.wait [#allocation11], 14336  }
  0x3d   :  { %991 = vsyncadd [#allocation11], 4294952960  ;;  %v128_v0 = vld [vmem:[#allocation9 + $0x78] sm:$0xff]  ;;  %v127_v1 = vld [vmem:[#allocation9 + $0x70] sm:$0xff]  ;;  %s1003_s2 = smov [#allocation13]  }
  0x3e   :  { %758 = vmatprep.subr.mxu0 %v128_v0  ;;  %v126_v2 = vld [vmem:[#allocation9 + $0x68] sm:$0xff]  ;;  %v125_v3 = vld [vmem:[#allocation9 + $0x60] sm:$0xff]  ;;  %v124_v6 = vld [vmem:[#allocation9 + $0x58] sm:$0xff]  ;;  %s656_s4 = sshll.u32 %s1003_s2, 4  ;;  %s657_s4 = int_to_ptr.vmem [resolvable:$true] %s656_s4 }
  0x3f   :  { %759 = vmatpush3.msra.mxu0 %v128_v0  ;;  %v87_v4 = vld [vmem:[#allocation4] sm:$0xff]  ;;  %v1052_v5 = vld [vmem:[#allocation4 + $0x8] sm:$0xff]  ;;  %v89_v7 = vld [vmem:[#allocation7] ss:$0 sm:$0xff]  ;;  %s966_s19 = scalar_lea.vmem %s657_s4, 512  ;;  %p971_p12 = scmp.lt.s32.totalorder %s657_s4, %s657_s4 }
  0x40   :  { %760 = vmatprep.subr.mxu0 %v127_v1  ;;  %v90_v8 = vld [vmem:[#allocation7 + $0x1] ss:$0 sm:$0xff]  ;;  %634 = vmatprep.mubr.f32.mxu1 %v87_v4  ;;  %v95_v9 = vmul.f32 %v89_v7, %v87_v4  ;;  %v96_v10 = vmul.f32 %v89_v7, %v1052_v5  ;;  %v122_v14 = vld [vmem:[#allocation9 + $0x48] sm:$0xff]  ;;  %v121_v17 = vld [vmem:[#allocation9 + $0x40] sm:$0xff]  ;;  %p967_p11 = scmp.ne.s32.totalorder %s657_s4, %s966_s19  ;;  %p972_p13 = scmp.lt.s32.totalorder %s966_s19, %s966_s19 }
  0x41   :  { %761 = vmatpush3.msra.mxu0 %v127_v1  ;;  %v123_v11 = vld [vmem:[#allocation9 + $0x50] sm:$0xff]  ;;  %v120_v18 = vld [vmem:[#allocation9 + $0x38] sm:$0xff]  ;;  %v118_v20 = vld [vmem:[#allocation9 + $0x28] sm:$0xff] }
  0x42   :  { %762 = vmatprep.subr.mxu0 %v126_v2  ;;  %v97_v12 = vadd.f32 %v95_v9, %v90_v8  ;;  %v98_v13 = vadd.f32 %v96_v10, %v90_v8  ;;  %v119_v19 = vld [vmem:[#allocation9 + $0x30] sm:$0xff]  ;;  %v117_v21 = vld [vmem:[#allocation9 + $0x20] sm:$0xff]  ;;  %v116_v22 = vld [vmem:[#allocation9 + $0x18] sm:$0xff]  ;;  %p973_p0 = por %p972_p13, %p971_p12 }
  0x43   :  { %763 = vmatpush3.msra.mxu0 %v126_v2  ;;  %v115_v23 = vld [vmem:[#allocation9 + $0x10] sm:$0xff]  ;;  %v114_v25 = vld [vmem:[#allocation9 + $0x8] sm:$0xff]  ;;  %v113_v28 = vld [vmem:[#allocation9] sm:$0xff] }
  0x44   :  { %764 = vmatprep.subr.mxu0 %v125_v3  ;;  %v670_v15 = vmul.f32 -1.442695, %v97_v12  ;;  %v671_v16 = vmul.f32 -1.442695, %v98_v13  ;;  %v306_v34 = vld [vmem:[#allocation10 + $0xf8] sm:$0xff]  ;;  %v305_v36 = vld [vmem:[#allocation10 + $0xf0] sm:$0xff]  ;;  %p974_p1 = pnand %p973_p0, %p967_p11 }
  0x45   :  { %765 = vmatpush3.msra.mxu0 %v125_v3  ;;  %v290_v35 = vld [vmem:[#allocation10 + $0x78] sm:$0xff]  ;;  %v289_v37 = vld [vmem:[#allocation10 + $0x70] sm:$0xff]  ;;  %v304_v38 = vld [vmem:[#allocation10 + $0xe8] sm:$0xff] }
  0x46   :  { %766 = vmatprep.subr.mxu0 %v124_v6  ;;  %842 = vpow2.f32 %v670_v15  ;;  %v288_v39 = vld [vmem:[#allocation10 + $0x68] sm:$0xff]  ;;  %v303_v40 = vld [vmem:[#allocation10 + $0xe0] sm:$0xff]  ;;  %v302_v42 = vld [vmem:[#allocation10 + $0xd8] sm:$0xff]  ;;  %v218_v15 = vlaneseq }
  0x47   :  { %767 = vmatpush3.msra.mxu0 %v124_v6  ;;  %844 = vpow2.f32 %v671_v16  ;;  %v287_v41 = vld [vmem:[#allocation10 + $0x60] sm:$0xff]  ;;  %v286_v43 = vld [vmem:[#allocation10 + $0x58] sm:$0xff]  ;;  %v301_v44 = vld [vmem:[#allocation10 + $0xd0] sm:$0xff] }
  0x48   :  { %768 = vmatprep.subr.mxu0 %v123_v11  ;;  %v285_v45 = vld [vmem:[#allocation10 + $0x50] sm:$0xff]  ;;  %v300_v46 = vld [vmem:[#allocation10 + $0xc8] sm:$0xff]  ;;  %v299_v48 = vld [vmem:[#allocation10 + $0xc0] sm:$0xff]  ;;  %v1055_v16 = vshrl.u32 %v218_v15, 7 }
  0x49   :  { %769 = vmatpush3.msra.mxu0 %v123_v11  ;;  %v284_v47 = vld [vmem:[#allocation10 + $0x48] sm:$0xff]  ;;  %v283_v49 = vld [vmem:[#allocation10 + $0x40] sm:$0xff]  ;;  %v298_v50 = vld [vmem:[#allocation10 + $0xb8] sm:$0xff] }
  0x4a   :  { %770 = vmatprep.subr.mxu0 %v122_v14  ;;  %v282_v51 = vld [vmem:[#allocation10 + $0x38] sm:$0xff]  ;;  %v297_v52 = vld [vmem:[#allocation10 + $0xb0] sm:$0xff]  ;;  %v296_v54 = vld [vmem:[#allocation10 + $0xa8] sm:$0xff]  ;;  %vm249_vm0 = vcmp.lt.s32.totalorder %v1055_v16, 1  ;;  %vm258_vm3 = vcmp.lt.s32.totalorder %v1055_v16, 7 }
  0x4b   :  { %771 = vmatpush3.msra.mxu0 %v122_v14  ;;  %v281_v53 = vld [vmem:[#allocation10 + $0x30] sm:$0xff]  ;;  %v280_v55 = vld [vmem:[#allocation10 + $0x28] sm:$0xff]  ;;  %v295_v56 = vld [vmem:[#allocation10 + $0xa0] sm:$0xff] }
  0x4c   :  { %772 = vmatprep.subr.mxu0 %v121_v17  ;;  %v279_v57 = vld [vmem:[#allocation10 + $0x20] sm:$0xff]  ;;  %v294_v58 = vld [vmem:[#allocation10 + $0x98] sm:$0xff]  ;;  %v293_v60 = vld [vmem:[#allocation10 + $0x90] sm:$0xff] }
  0x4d   :  { %773 = vmatpush3.msra.mxu0 %v121_v17  ;;  %v278_v59 = vld [vmem:[#allocation10 + $0x18] sm:$0xff]  ;;  %v277_v61 = vld [vmem:[#allocation10 + $0x10] sm:$0xff]  ;;  %v292_v62 = vld [vmem:[#allocation10 + $0x88] sm:$0xff] }
  0x4e   :  { %774 = vmatprep.subr.mxu0 %v120_v18  ;;  %v276_v63 = vld [vmem:[#allocation10 + $0x8] sm:$0xff]  ;;  %v291_v0 = vld [vmem:[#allocation10 + $0x80] sm:$0xff]  ;;  %v322_v2 = vld [vmem:[#allocation10 + $0x178] sm:$0xff] }
  0x4f   :  { %775 = vmatpush3.msra.mxu0 %v120_v18  ;;  %v275_v1 = vld [vmem:[#allocation10] sm:$0xff]  ;;  %v91_v3 = vld [vmem:[#allocation7 + $0x2] ss:$0 sm:$0xff] }
  0x50   :  { %776 = vmatprep.subr.mxu0 %v119_v19  ;;  %v495_v15 = vld [vmem:[#allocation12] sm:$0xff] }
  0x51   :  { %777 = vmatpush3.msra.mxu0 %v119_v19  ;;  %v225_v19 = vand.u32 7, %v1055_v16 }
  0x52   :  { %778 = vmatprep.subr.mxu0 %v118_v20 }
  0x53   :  { %779 = vmatpush3.msra.mxu0 %v118_v20  ;;  %v843_v24 = vpop.eup %842  ;;  %v1061_v20 = vadd.s32 8, %v1055_v16  ;;  %vm828_vm1 = vcmp.ne.s32.totalorder %v225_v19, 0  ;;  %vm830_vm4 = vcmp.ne.s32.totalorder %v225_v19, 7  ;;  %v556_v19 = vld [vmem:[#allocation12 + $0x1e8] sm:$0xff] }
  0x54   :  { %780 = vmatprep.subr.mxu0 %v117_v21  ;;  %v845_v26 = vpop.eup %844  ;;  %v105_v27 = vadd.f32 1.0, %v843_v24 }
  0x55   :  { %781 = vmatpush3.msra.mxu0 %v117_v21  ;;  %v106_v29 = vadd.f32 1.0, %v845_v26 }
  0x56   :  { %782 = vmatprep.subr.mxu0 %v116_v22  ;;  %846 = vrcp.f32 %v105_v27  ;;  %v321_v27 = vld [vmem:[#allocation10 + $0x170] sm:$0xff] }
  0x57   :  { %783 = vmatpush3.msra.mxu0 %v116_v22  ;;  %848 = vrcp.f32 %v106_v29  ;;  %v320_v29 = vld [vmem:[#allocation10 + $0x168] sm:$0xff] }
  0x58   :  { %784 = vmatprep.subr.mxu0 %v115_v23 }
  0x59   :  { %785 = vmatpush3.msra.mxu0 %v115_v23 }
  0x5a   :  { %786 = vmatprep.subr.mxu0 %v114_v25 }
  0x5b   :  { %787 = vmatpush3.msra.mxu0 %v114_v25  ;;  %v232_v25 = vand.u32 7, %v1061_v20  ;;  %v555_v20 = vld [vmem:[#allocation12 + $0x1e0] sm:$0xff] }
  0x5c   :  { %788 = vmatprep.subr.mxu0 %v113_v28 }
  0x5d   :  { %789 = vmatpush3.msra.mxu0 %v113_v28  ;;  %vm829_vm2 = vcmp.ne.s32.totalorder %v232_v25, 0  ;;  %vm831_vm5 = vcmp.ne.s32.totalorder %v232_v25, 7  ;;  %v550_v25 = vld [vmem:[#allocation12 + $0x1b8] sm:$0xff] }
  0x5e   :  { %702 = vmatprep.subr.mxu0 %v306_v34  ;;  %v318_v34 = vld [vmem:[#allocation10 + $0x158] sm:$0xff] }
  0x63   :  { %v847_v30 = vpop.eup %846 }
  0x64   :  { %v849_v31 = vpop.eup %848  ;;  %v111_v32 = vmul.f32 %v847_v30, %v97_v12 }
  0x65   :  { %v112_v33 = vmul.f32 %v849_v31, %v98_v13 }
  0x66   :  { %790 = vmatprep.mubr.f32.mxu0 %v111_v32  ;;  %v319_v32 = vld [vmem:[#allocation10 + $0x160] sm:$0xff] }
  0x67   :  { %791 = vmatmul.mubr.f32.vlgmr.msra.gmra.mxu0 %v112_v33 }
  0x68   :  { %703 = vmatpush3.msra.mxu0 %v290_v35  ;;  %v317_v35 = vld [vmem:[#allocation10 + $0x150] sm:$0xff] }
  0x69   :  { %704 = vmatprep.subr.mxu0 %v305_v36  ;;  %v316_v36 = vld [vmem:[#allocation10 + $0x148] sm:$0xff] }
  0x6a   :  { %705 = vmatpush3.msra.mxu0 %v289_v37  ;;  %v315_v37 = vld [vmem:[#allocation10 + $0x140] sm:$0xff] }
  0x6b   :  { %706 = vmatprep.subr.mxu0 %v304_v38  ;;  %v314_v38 = vld [vmem:[#allocation10 + $0x138] sm:$0xff] }
  0x6c   :  { %707 = vmatpush3.msra.mxu0 %v288_v39  ;;  %v313_v39 = vld [vmem:[#allocation10 + $0x130] sm:$0xff] }
  0x6d   :  { %708 = vmatprep.subr.mxu0 %v303_v40  ;;  %v312_v40 = vld [vmem:[#allocation10 + $0x128] sm:$0xff] }
  0x6e   :  { %709 = vmatpush3.msra.mxu0 %v287_v41  ;;  %v311_v41 = vld [vmem:[#allocation10 + $0x120] sm:$0xff] }
  0x6f   :  { %710 = vmatprep.subr.mxu0 %v302_v42  ;;  %v310_v42 = vld [vmem:[#allocation10 + $0x118] sm:$0xff] }
  0x70   :  { %711 = vmatpush3.msra.mxu0 %v286_v43  ;;  %v309_v43 = vld [vmem:[#allocation10 + $0x110] sm:$0xff] }
  0x71   :  { %712 = vmatprep.subr.mxu0 %v301_v44  ;;  %v308_v44 = vld [vmem:[#allocation10 + $0x108] sm:$0xff] }
  0x72   :  { %713 = vmatpush3.msra.mxu0 %v285_v45  ;;  %v307_v45 = vld [vmem:[#allocation10 + $0x100] sm:$0xff] }
  0x73   :  { %714 = vmatprep.subr.mxu0 %v300_v46 }
  0x74   :  { %715 = vmatpush3.msra.mxu0 %v284_v47  ;;  %v526_v47 = vld [vmem:[#allocation12 + $0xf8] sm:$0xff] }
  0x75   :  { %716 = vmatprep.subr.mxu0 %v299_v48  ;;  %570 = vmatprep.subr.mxu1 %v526_v47  ;;  %v525_v48 = vld [vmem:[#allocation12 + $0xf0] sm:$0xff]  ;;  %v528_v47 = vld [vmem:[#allocation12 + $0x108] sm:$0xff] }
  0x76   :  { %717 = vmatpush3.msra.mxu0 %v283_v49  ;;  %v524_v49 = vld [vmem:[#allocation12 + $0xe8] sm:$0xff]  ;;  %571 = vmatpush1.msra.mxu1 %v525_v48  ;;  %v527_v48 = vld [vmem:[#allocation12 + $0x100] sm:$0xff] }
  0x77   :  { %718 = vmatprep.subr.mxu0 %v298_v50  ;;  %v523_v50 = vld [vmem:[#allocation12 + $0xe0] sm:$0xff]  ;;  %572 = vmatprep.subr.mxu1 %v524_v49 }
  0x78   :  { %719 = vmatpush3.msra.mxu0 %v282_v51  ;;  %v522_v51 = vld [vmem:[#allocation12 + $0xd8] sm:$0xff]  ;;  %573 = vmatpush1.msra.mxu1 %v523_v50 }
  0x79   :  { %720 = vmatprep.subr.mxu0 %v297_v52  ;;  %v521_v52 = vld [vmem:[#allocation12 + $0xd0] sm:$0xff]  ;;  %574 = vmatprep.subr.mxu1 %v522_v51 }
  0x7a   :  { %721 = vmatpush3.msra.mxu0 %v281_v53  ;;  %v520_v53 = vld [vmem:[#allocation12 + $0xc8] sm:$0xff]  ;;  %575 = vmatpush1.msra.mxu1 %v521_v52 }
  0x7b   :  { %722 = vmatprep.subr.mxu0 %v296_v54  ;;  %v519_v54 = vld [vmem:[#allocation12 + $0xc0] sm:$0xff]  ;;  %576 = vmatprep.subr.mxu1 %v520_v53 }
  0x7c   :  { %723 = vmatpush3.msra.mxu0 %v280_v55  ;;  %v518_v55 = vld [vmem:[#allocation12 + $0xb8] sm:$0xff]  ;;  %577 = vmatpush1.msra.mxu1 %v519_v54 }
  0x7d   :  { %724 = vmatprep.subr.mxu0 %v295_v56  ;;  %v517_v56 = vld [vmem:[#allocation12 + $0xb0] sm:$0xff]  ;;  %578 = vmatprep.subr.mxu1 %v518_v55 }
  0x7e   :  { %725 = vmatpush3.msra.mxu0 %v279_v57  ;;  %v516_v57 = vld [vmem:[#allocation12 + $0xa8] sm:$0xff]  ;;  %579 = vmatpush1.msra.mxu1 %v517_v56  ;;  %v92_v55 = vld [vmem:[#allocation7 + $0x3] ss:$0 sm:$0xff] }
  0x7f   :  { %726 = vmatprep.subr.mxu0 %v294_v58  ;;  %v515_v58 = vld [vmem:[#allocation12 + $0xa0] sm:$0xff]  ;;  %580 = vmatprep.subr.mxu1 %v516_v57 }
  0x80   :  { %727 = vmatpush3.msra.mxu0 %v278_v59  ;;  %v514_v59 = vld [vmem:[#allocation12 + $0x98] sm:$0xff]  ;;  %581 = vmatpush1.msra.mxu1 %v515_v58 }
  0x81   :  { %728 = vmatprep.subr.mxu0 %v293_v60  ;;  %v513_v60 = vld [vmem:[#allocation12 + $0x90] sm:$0xff]  ;;  %582 = vmatprep.subr.mxu1 %v514_v59 }
  0x82   :  { %729 = vmatpush3.msra.mxu0 %v277_v61  ;;  %v512_v61 = vld [vmem:[#allocation12 + $0x88] sm:$0xff]  ;;  %583 = vmatpush1.msra.mxu1 %v513_v60 }
  0x83   :  { %730 = vmatprep.subr.mxu0 %v292_v62  ;;  %v511_v62 = vld [vmem:[#allocation12 + $0x80] sm:$0xff]  ;;  %584 = vmatprep.subr.mxu1 %v512_v61 }
  0x84   :  { %731 = vmatpush3.msra.mxu0 %v276_v63  ;;  %v510_v63 = vld [vmem:[#allocation12 + $0x78] sm:$0xff]  ;;  %585 = vmatpush1.msra.mxu1 %v511_v62 }
  0x85   :  { %732 = vmatprep.subr.mxu0 %v291_v0  ;;  %v509_v0 = vld [vmem:[#allocation12 + $0x70] sm:$0xff]  ;;  %586 = vmatprep.subr.mxu1 %v510_v63 }
  0x86   :  { %733 = vmatpush3.msra.mxu0 %v275_v1  ;;  %v508_v1 = vld [vmem:[#allocation12 + $0x68] sm:$0xff]  ;;  %587 = vmatpush1.msra.mxu1 %v509_v0 }
  0x87   :  { %793 = vmatprep.subr.mxu0 %v322_v2  ;;  %588 = vmatprep.subr.mxu1 %v508_v1 }
 0x127   :  { %v792_v4 = vpop.f32.mrf.mxu0 }
 0x128   :  { %v201_v6 = vadd.f32 %v792_v4, %v91_v3  ;;  %v505_v4 = vld [vmem:[#allocation12 + $0x50] sm:$0xff] }
 0x129   :  { %v195_v7 = vpop.f32.mrf.mxu0 }
 0x12a   :  { %v673_v8 = vmul.f32 -1.442695, %v201_v6  ;;  %v196_v9 = vadd.f32 %v195_v7, %v91_v3  ;;  %v506_v3 = vld [vmem:[#allocation12 + $0x58] sm:$0xff]  ;;  %v503_v7 = vld [vmem:[#allocation12 + $0x40] sm:$0xff] }
 0x12c   :  { %850 = vpow2.f32 %v673_v8  ;;  %v672_v10 = vmul.f32 -1.442695, %v196_v9  ;;  %v502_v8 = vld [vmem:[#allocation12 + $0x38] sm:$0xff] }
 0x12e   :  { %852 = vpow2.f32 %v672_v10  ;;  %v500_v10 = vld [vmem:[#allocation12 + $0x28] sm:$0xff] }
 0x139   :  { %v851_v11 = vpop.eup %850 }
 0x13a   :  { %v211_v12 = vadd.f32 1.0, %v851_v11  ;;  %v499_v11 = vld [vmem:[#allocation12 + $0x20] sm:$0xff] }
 0x13b   :  { %v853_v13 = vpop.eup %852 }
 0x13c   :  { %854 = vrcp.f32 %v211_v12  ;;  %v210_v14 = vadd.f32 1.0, %v853_v13  ;;  %v498_v12 = vld [vmem:[#allocation12 + $0x18] sm:$0xff]  ;;  %v497_v13 = vld [vmem:[#allocation12 + $0x10] sm:$0xff] }
 0x13e   :  { %856 = vrcp.f32 %v210_v14  ;;  %v496_v14 = vld [vmem:[#allocation12 + $0x8] sm:$0xff] }
 0x149   :  { %v855_v17 = vpop.eup %854 }
 0x14a   :  { %v1057_v18 = vmul.f32 %v855_v17, %v201_v6  ;;  %v504_v6 = vld [vmem:[#allocation12 + $0x48] sm:$0xff]  ;;  %v558_v17 = vld [vmem:[#allocation12 + $0x1f8] sm:$0xff] }
 0x14b   :  { %v857_v21 = vpop.eup %856 }
 0x14c   :  { %v1063_v22 = vmul.f32 %v857_v21, %v196_v9  ;;  %v248_v23 = vrot.slane %v1057_v18, 7  ;;  %v257_v30 = vrot.slane %v1057_v18, 1  ;;  %v501_v9 = vld [vmem:[#allocation12 + $0x30] sm:$0xff]  ;;  %v554_v21 = vld [vmem:[#allocation12 + $0x1d8] sm:$0xff] }
 0x14e   :  { %v247_v24 = vrot.slane %v1063_v22, 7  ;;  %387 = vmatprep.mubr.f32.mxu0 %v1063_v22  ;;  %v256_v28 = vrot.slane %v1063_v22, 1  ;;  %v553_v22 = vld [vmem:[#allocation12 + $0x1d0] sm:$0xff] }
 0x150   :  { %v251_v26 = vsel %vm249_vm0, %v248_v23, %v247_v24  ;;  %v250_v31 = vsel %vm249_vm0, %v247_v24, %v248_v23  ;;  %v259_v33 = vsel %vm258_vm3, %v256_v28, %v257_v30  ;;  %v260_v46 = vsel %vm258_vm3, %v257_v30, %v256_v28  ;;  %v552_v23 = vld [vmem:[#allocation12 + $0x1c8] sm:$0xff]  ;;  %v551_v24 = vld [vmem:[#allocation12 + $0x1c0] sm:$0xff]  ;;  %v545_v30 = vld [vmem:[#allocation12 + $0x190] sm:$0xff] }
 0x151   :  { %677 = vmatmul.mubr.msk.f32.vlgmr.msra.gmra.mxu0 %vm828_vm1, %v251_v26  ;;  %v549_v26 = vld [vmem:[#allocation12 + $0x1b0] sm:$0xff]  ;;  %v547_v28 = vld [vmem:[#allocation12 + $0x1a0] sm:$0xff] }
 0x152   :  { %794 = vmatpush3.msra.mxu0 %v322_v2  ;;  %392 = vmatprep.mubr.f32.mxu0 %v1057_v18  ;;  %v507_v2 = vld [vmem:[#allocation12 + $0x60] sm:$0xff]  ;;  %v557_v18 = vld [vmem:[#allocation12 + $0x1f0] sm:$0xff] }
 0x153   :  { %795 = vmatprep.subr.mxu0 %v321_v27  ;;  %589 = vmatpush1.msra.mxu1 %v507_v2 }
 0x154   :  { %796 = vmatpush3.msra.mxu0 %v321_v27  ;;  %590 = vmatprep.subr.mxu1 %v506_v3  ;;  %v548_v27 = vld [vmem:[#allocation12 + $0x1a8] sm:$0xff] }
 0x155   :  { %797 = vmatprep.subr.mxu0 %v320_v29  ;;  %679 = vmatmul.mubr.msk.f32.gmra.mxu0 %vm829_vm2, %v250_v31  ;;  %v544_v31 = vld [vmem:[#allocation12 + $0x188] sm:$0xff] }
 0x156   :  { %798 = vmatpush3.msra.mxu0 %v320_v29  ;;  %825 = vmatprep.mubr.msk.f32.mxu0 %vm830_vm4, %v259_v33  ;;  %v546_v29 = vld [vmem:[#allocation12 + $0x198] sm:$0xff] }
 0x157   :  { %799 = vmatprep.subr.mxu0 %v319_v32  ;;  %591 = vmatpush1.msra.mxu1 %v505_v4  ;;  %v542_v33 = vld [vmem:[#allocation12 + $0x178] sm:$0xff] }
 0x158   :  { %800 = vmatpush3.msra.mxu0 %v319_v32  ;;  %592 = vmatprep.subr.mxu1 %v504_v6  ;;  %v543_v32 = vld [vmem:[#allocation12 + $0x180] sm:$0xff] }
 0x159   :  { %801 = vmatprep.subr.mxu0 %v318_v34  ;;  %593 = vmatpush1.msra.mxu1 %v503_v7 }
 0x15a   :  { %802 = vmatpush3.msra.mxu0 %v318_v34  ;;  %594 = vmatprep.subr.mxu1 %v502_v8  ;;  %v541_v34 = vld [vmem:[#allocation12 + $0x170] sm:$0xff] }
 0x15b   :  { %803 = vmatprep.subr.mxu0 %v317_v35  ;;  %595 = vmatpush1.msra.mxu1 %v501_v9  ;;  %v562_v9 = vsub.s32 0, %v1055_v16 }
 0x15c   :  { %804 = vmatpush3.msra.mxu0 %v317_v35  ;;  %596 = vmatprep.subr.mxu1 %v500_v10  ;;  %v540_v35 = vld [vmem:[#allocation12 + $0x168] sm:$0xff]  ;;  %v94_v10 = vld [vmem:[#allocation7 + $0x4] ss:$8 sm:$0x3] }
 0x15d   :  { %805 = vmatprep.subr.mxu0 %v316_v36  ;;  %597 = vmatpush1.msra.mxu1 %v499_v11  ;;  %v566_v11 = vsub.s32 1, %v1055_v16 }
 0x15e   :  { %806 = vmatpush3.msra.mxu0 %v316_v36  ;;  %598 = vmatprep.subr.mxu1 %v498_v12  ;;  %v539_v36 = vld [vmem:[#allocation12 + $0x160] sm:$0xff]  ;;  %v563_v12 = vrot.slane %v94_v10, %v562_v9 }
 0x15f   :  { %807 = vmatprep.subr.mxu0 %v315_v37  ;;  %599 = vmatpush1.msra.mxu1 %v497_v13  ;;  %v567_v13 = vrot.slane %v94_v10, %v566_v11 }
 0x160   :  { %808 = vmatpush3.msra.mxu0 %v315_v37  ;;  %600 = vmatprep.subr.mxu1 %v496_v14  ;;  %v538_v37 = vld [vmem:[#allocation12 + $0x158] sm:$0xff] }
 0x161   :  { %809 = vmatprep.subr.mxu0 %v314_v38  ;;  %601 = vmatpush1.msra.mxu1 %v495_v15 }
 0x162   :  { %810 = vmatpush3.msra.mxu0 %v314_v38  ;;  %602 = vmatprep.subr.mxu1 %v558_v17  ;;  %v537_v38 = vld [vmem:[#allocation12 + $0x150] sm:$0xff] }
 0x163   :  { %811 = vmatprep.subr.mxu0 %v313_v39  ;;  %603 = vmatpush2.msra.mxu1 %v557_v18 }
 0x164   :  { %812 = vmatpush3.msra.mxu0 %v313_v39  ;;  %604 = vmatprep.subr.mxu1 %v556_v19  ;;  %v536_v39 = vld [vmem:[#allocation12 + $0x148] sm:$0xff] }
 0x165   :  { %813 = vmatprep.subr.mxu0 %v312_v40  ;;  %605 = vmatpush2.msra.mxu1 %v555_v20 }
 0x166   :  { %814 = vmatpush3.msra.mxu0 %v312_v40  ;;  %606 = vmatprep.subr.mxu1 %v554_v21  ;;  %v535_v40 = vld [vmem:[#allocation12 + $0x140] sm:$0xff] }
 0x167   :  { %815 = vmatprep.subr.mxu0 %v311_v41  ;;  %607 = vmatpush2.msra.mxu1 %v553_v22 }
 0x168   :  { %816 = vmatpush3.msra.mxu0 %v311_v41  ;;  %608 = vmatprep.subr.mxu1 %v552_v23  ;;  %v534_v41 = vld [vmem:[#allocation12 + $0x138] sm:$0xff] }
 0x169   :  { %817 = vmatprep.subr.mxu0 %v310_v42  ;;  %609 = vmatpush2.msra.mxu1 %v551_v24 }
 0x16a   :  { %818 = vmatpush3.msra.mxu0 %v310_v42  ;;  %610 = vmatprep.subr.mxu1 %v550_v25  ;;  %v533_v42 = vld [vmem:[#allocation12 + $0x130] sm:$0xff] }
 0x16b   :  { %819 = vmatprep.subr.mxu0 %v309_v43  ;;  %611 = vmatpush2.msra.mxu1 %v549_v26 }
 0x16c   :  { %820 = vmatpush3.msra.mxu0 %v309_v43  ;;  %612 = vmatprep.subr.mxu1 %v548_v27  ;;  %v532_v43 = vld [vmem:[#allocation12 + $0x128] sm:$0xff] }
 0x16d   :  { %821 = vmatprep.subr.mxu0 %v308_v44  ;;  %613 = vmatpush2.msra.mxu1 %v547_v28 }
 0x16e   :  { %822 = vmatpush3.msra.mxu0 %v308_v44  ;;  %614 = vmatprep.subr.mxu1 %v546_v29  ;;  %v531_v44 = vld [vmem:[#allocation12 + $0x120] sm:$0xff] }
 0x16f   :  { %823 = vmatprep.subr.mxu0 %v307_v45  ;;  %615 = vmatpush2.msra.mxu1 %v545_v30 }
 0x170   :  { %824 = vmatpush3.msra.mxu0 %v307_v45  ;;  %616 = vmatprep.subr.mxu1 %v544_v31  ;;  %v530_v45 = vld [vmem:[#allocation12 + $0x118] sm:$0xff] }
 0x171   :  { %826 = vmatmul.mubr.msk.f32.vlgmr.msra.gmra.mxu0 %vm831_vm5, %v260_v46  ;;  %617 = vmatpush2.msra.mxu1 %v543_v32  ;;  %v529_v46 = vld [vmem:[#allocation12 + $0x110] sm:$0xff] }
 0x172   :  { %618 = vmatprep.subr.mxu1 %v542_v33 }
 0x173   :  { %619 = vmatpush2.msra.mxu1 %v541_v34 }
 0x174   :  { %620 = vmatprep.subr.mxu1 %v540_v35 }
 0x175   :  { %621 = vmatpush2.msra.mxu1 %v539_v36 }
 0x176   :  { %622 = vmatprep.subr.mxu1 %v538_v37 }
 0x177   :  { %623 = vmatpush2.msra.mxu1 %v537_v38 }
 0x178   :  { %624 = vmatprep.subr.mxu1 %v536_v39 }
 0x179   :  { %625 = vmatpush2.msra.mxu1 %v535_v40 }
 0x17a   :  { %626 = vmatprep.subr.mxu1 %v534_v41 }
 0x17b   :  { %627 = vmatpush2.msra.mxu1 %v533_v42 }
 0x17c   :  { %628 = vmatprep.subr.mxu1 %v532_v43 }
 0x17d   :  { %629 = vmatpush2.msra.mxu1 %v531_v44 }
 0x17e   :  { %630 = vmatprep.subr.mxu1 %v530_v45 }
 0x17f   :  { %631 = vmatpush2.msra.mxu1 %v529_v46 }
 0x180   :  { %632 = vmatprep.subr.mxu1 %v528_v47 }
 0x181   :  { %633 = vmatpush2.msra.mxu1 %v527_v48 }
 0x211   :  { %v734_v49 = vpop.f32.mrf.mxu0 }
 0x213   :  { %v735_v50 = vpop.f32.mrf.mxu0 }
 0x214   :  { %v736_v54 = vadd.f32 %v735_v50, %v734_v49 }
 0x215   :  { %v737_v51 = vpop.f32.mrf.mxu0 }
 0x216   :  { %v390_v59 = vadd.f32 %v736_v54, %v92_v55 }
 0x217   :  { %v738_v52 = vpop.f32.mrf.mxu0 }
 0x218   :  { %v739_v53 = vadd.f32 %v738_v52, %v737_v51 }
 0x21a   :  { %v395_v56 = vadd.f32 %v739_v53, %v92_v55 }
 0x231   :  { %v827_v57 = vpop.f32.mrf.mxu0 }
 0x232   :  { %v470_v58 = vadd.f32 %v827_v57, %v395_v56 }
 0x233   :  { %v464_v60 = vpop.f32.mrf.mxu0 }
 0x234   :  { %v675_v61 = vmul.f32 -1.442695, %v470_v58  ;;  %v465_v62 = vadd.f32 %v464_v60, %v390_v59 }
 0x236   :  { %858 = vpow2.f32 %v675_v61  ;;  %v674_v63 = vmul.f32 -1.442695, %v465_v62 }
 0x238   :  { %860 = vpow2.f32 %v674_v63 }
 0x243   :  { %v859_v0 = vpop.eup %858 }
 0x244   :  { %v480_v2 = vadd.f32 1.0, %v859_v0 }
 0x245   :  { %v861_v1 = vpop.eup %860 }
 0x246   :  { %v479_v3 = vadd.f32 1.0, %v861_v1 }
 0x248   :  { %862 = vrcp.f32 %v479_v3 }
 0x249   :  { %864 = vrcp.f32 %v480_v2 }
 0x255   :  { %v863_v4 = vpop.eup %862 }
 0x256   :  { %v485_v6 = vmul.f32 %v863_v4, %v465_v62  ;;  %v865_v7 = vpop.eup %864 }
 0x257   :  { %v486_v8 = vmul.f32 %v865_v7, %v470_v58 }
 0x258   :  { %635 = vmatmul.mubr.f32.vlgmr.msra.gmra.mxu1 %v485_v6 }
 0x259   :  { %640 = vmatprep.mubr.f32.mxu1 %v1052_v5 }
 0x25c   :  { %641 = vmatmul.mubr.f32.gmra.mxu1 %v486_v8 }
 0x318   :  { %v636_v14 = vpop.f32.mrf.mxu1 }
 0x319   :  { %v637_v15 = vadd.f32 %v636_v14, %v563_v12 }
 0x31a   :  { %v638_v17 = vpop.f32.mrf.mxu1 }
 0x31b   :  { %647 = vst [vmem:[#allocation13] sm:$0xff] %v637_v15  ;;  %v639_v18 = vadd.f32 %v638_v17, %v567_v13 }
 0x31c   :  { %v642_v19 = vpop.f32.mrf.mxu1 }
 0x31d   :  { %648 = vst [vmem:[#allocation13 + $0x8] sm:$0xff] %v639_v18  ;;  %v643_v20 = vadd.f32 %v642_v19, %v563_v12 }
 0x31e   :  { %v644_v5 = vpop.f32.mrf.mxu1 }
 0x31f   :  { %649 = vst [vmem:[#allocation13 + $0x10] sm:$0xff] %v643_v20  ;;  %v645_v21 = vadd.f32 %v644_v5, %v567_v13 }
 0x321   :  { %650 = vst [vmem:[#allocation13 + $0x18] sm:$0xff] %v645_v21 }
 0x322   :  { %977 = shalt.err (!%p974_p1)
}
 0x323   :  { %662 = dma.vmem_to_hbm [thread:$0]  %s657_s4, 512, %s1096_s5, [#allocation6], %s1001_s0, %s1001_s0, %s1002_s16  }
 0x324   :  { %992 = dma.done.wait [#allocation6], 512  }
 0x325   :  { %993 = vsyncadd [#allocation6], 4294966784 }
 0x326   :  { %666 = vsyncpa [#allocation5], 1 }
 0x327   :  { %667 = vsyncpa [#allocation8], 1 }
 0x328   :  { %668 = vsyncpa [#allocation11], 1 }
 0x329   :  { %669 = vsyncpa [#allocation6], 1 }

</bundles_post_ra>
